<compile_context>
chip_gen: v7x
topology: tpu7x:2x2x1
jax: 0.10.0
libtpu: 0.0.40
codegen_flags: <defaults>
</compile_context>

<pallas_src>
import functools

import jax
import jax.numpy as jnp
import numpy as np
from jax import lax
from jax.experimental import pallas as pl
from jax.experimental.pallas import tpu as pltpu


# ----------------------------------------------------------------------------
# Pass 1: parity-decomposed transposed conv + per-channel sum / sum-of-squares
# ----------------------------------------------------------------------------
def conv_stats_kernel(xc_ref, w_ref, y_ref, sum_ref, ssq_ref):
    """
    xc_ref:  (4, 4*Cin, TL) bf16  per-parity im2col lane tile (lanes = (n, h, w))
    w_ref:   (4, Cout, 4*Cin) bf16  per-parity packed ConvT weights (fetched once)
    y_ref:   (4, Cout, TL)  bf16  pre-BN conv output tile (intermediate)
    sum_ref: (Cout, 1)      f32   per-channel running sum    (grid-resident)
    ssq_ref: (Cout, 1)      f32   per-channel running sum-sq (grid-resident)
    """
    @pl.when(pl.program_id(0) == 0)
    def _():
        sum_ref[...] = jnp.zeros_like(sum_ref)
        ssq_ref[...] = jnp.zeros_like(ssq_ref)

    s1 = jnp.zeros(sum_ref.shape, jnp.float32)
    s2 = jnp.zeros(ssq_ref.shape, jnp.float32)
    for p in range(4):  # static unroll over the 4 output parity classes
        # K = 4*Cin contraction, no structural zeros; f32 accumulation on the MXU.
        y = jnp.dot(w_ref[p], xc_ref[p], preferred_element_type=jnp.float32)
        s1 = s1 + jnp.sum(y, axis=1, keepdims=True)
        s2 = s2 + jnp.sum(y * y, axis=1, keepdims=True)
        y_ref[p] = y.astype(y_ref.dtype)
    sum_ref[...] += s1
    ssq_ref[...] += s2


# ----------------------------------------------------------------------------
# Pass 2: BatchNorm (precomputed per-channel affine) + ReLU
# ----------------------------------------------------------------------------
def bn_relu_kernel(y_ref, scale_ref, shift_ref, o_ref):
    """
    y_ref:     (4, Cout, TL) bf16 ; scale/shift: (Cout, 1) f32 ; o_ref: (4, Cout, TL)
    """
    y = y_ref[...].astype(jnp.float32)
    o_ref[...] = jnp.maximum(y * scale_ref[...] + shift_ref[...],
                             0.0).astype(o_ref.dtype)


# ----------------------------------------------------------------------------
# Spectral norm (PyTorch-style: one power iteration, dim=1 for ConvTranspose2d)
# ----------------------------------------------------------------------------
def spectral_normalize(w, u, eps=1e-12):
    # TODO(synk): PyTorch keeps u as a persistent buffer updated in-place every
    # forward; here it is functional state (feed the returned u into the next step).
    cout = w.shape[1]
    w_mat = jnp.transpose(w, (1, 0, 2, 3)).reshape(cout, -1)   # (Cout, Cin*kh*kw)
    v = w_mat.T @ u
    v = v / (jnp.linalg.norm(v) + eps)
    u_new = w_mat @ v
    u_new = u_new / (jnp.linalg.norm(u_new) + eps)
    sigma = jnp.dot(u_new, w_mat @ v)
    return w / sigma, u_new


def _pick_lane_tile(total, target):
    """Largest multiple of 128 dividing `total` and <= target (falls back to total)."""
    best = total
    t = 128
    while t <= min(total, target):
        if total % t == 0:
            best = t
        t += 128
    return best


# ----------------------------------------------------------------------------
# Wrapper: weight packing + parity im2col + two gridded pallas_calls
# ----------------------------------------------------------------------------
@functools.partial(jax.jit, static_argnames=("lane_tile", "out_dtype"))
def upblock_forward(x_nchw, w, b, gamma, beta, u, *, lane_tile=2048,
                    out_dtype=jnp.float32):
    """x: (N, Cin, H, W) NCHW -> (N, Cout, 2H, 2W) NCHW."""
    # ConvT bias is exactly cancelled by train-mode BatchNorm mean subtraction,
    # so it never enters the kernel (dead work otherwise).
    del b
    N, Cin, H, W = x_nchw.shape
    Cout = w.shape[1]
    Ho, Wo = 2 * H, 2 * W
    L = N * H * W                       # lane axis length per parity class
    TL = _pick_lane_tile(L, lane_tile)  # multiple of 128 (or full L)
    T = L // TL

    w_sn, _ = spectral_normalize(w, u)
    # TODO(synk): PyTorch also updates BatchNorm running_mean/running_var
    # (unbiased) and the spectral-norm u buffer each training step; this
    # functional wrapper returns only the activation.

    # ---- per-parity packed weights:
    #      w_par[pr*2+pc, co, (dh*2+dw)*Cin+ci] = w_sn[ci, co, 3-pr-2dh, 3-pc-2dw]
    w_flip = w_sn[:, :, ::-1, ::-1]
    w_blocks = []
    for pr in range(2):
        for pc in range(2):
            wb = w_flip[:, :, pr::2, pc::2]           # (Cin, Cout, dh, dw)
            wb = jnp.transpose(wb, (1, 2, 3, 0))      # (Cout, dh, dw, ci)
            w_blocks.append(wb.reshape(Cout, 4 * Cin))
    w_par = jnp.stack(w_blocks, axis=0).astype(jnp.bfloat16)     # (4, Cout, 4*Cin)

    # ---- per-parity im2col (K = 4*Cin, zero structural zeros), lanes = (n, h, w):
    #      xc[pr*2+pc, (dh*2+dw)*Cin+ci, n*H*W+m*W+w] = x_pad[n, ci, m+pr+dh, w+pc+dw]
    x_pad = jnp.pad(x_nchw, ((0, 0), (0, 0), (1, 1), (1, 1)))
    cols = []
    for pr in range(2):
        for pc in range(2):
            taps = [x_pad[:, :, pr + dh:pr + dh + H, pc + dw:pc + dw + W]
                    for dh in range(2) for dw in range(2)]          # 4 x (N,Cin,H,W)
            t = jnp.transpose(jnp.stack(taps, 0), (0, 2, 1, 3, 4))  # (4,Cin,N,H,W)
            cols.append(t.reshape(4 * Cin, L))
    x_cols = jnp.stack(cols, axis=0).astype(jnp.bfloat16)           # (4, 4*Cin, L)

    # ---- pass 1: conv + per-channel stats (lane-tiled grid, resident accumulators)
    y_blk, s1, s2 = pl.pallas_call(
        conv_stats_kernel,
        grid=(T,),
        in_specs=(
            pl.BlockSpec((4, 4 * Cin, TL), lambda t: (0, 0, t)),
            pl.BlockSpec((4, Cout, 4 * Cin), lambda t: (0, 0, 0)),
        ),
        out_specs=(
            pl.BlockSpec((4, Cout, TL), lambda t: (0, 0, t)),
            pl.BlockSpec((Cout, 1), lambda t: (0, 0)),
            pl.BlockSpec((Cout, 1), lambda t: (0, 0)),
        ),
        out_shape=(
            jax.ShapeDtypeStruct((4, Cout, L), jnp.bfloat16),   # pre-BN y (bf16)
            jax.ShapeDtypeStruct((Cout, 1), jnp.float32),       # sum
            jax.ShapeDtypeStruct((Cout, 1), jnp.float32),       # sum of squares
        ),
        compiler_params=pltpu.CompilerParams(
            dimension_semantics=("arbitrary",),        # stats blocks are revisited
            vmem_limit_bytes=32 * 1024 * 1024,
            allow_input_fusion=[True, False],          # fuse im2col staging into input
        ),
    )(x_cols, w_par)

    # ---- batch stats (biased variance, training-mode BN) -> per-channel affine
    cnt = jnp.float32(N * Ho * Wo)
    mean = s1 / cnt
    var = jnp.maximum(s2 / cnt - mean * mean, 0.0)     # f32 accumulators: safe here
    scale = gamma.reshape(Cout, 1) * lax.rsqrt(var + 1e-5)
    shift = beta.reshape(Cout, 1) - mean * scale

    # ---- pass 2: normalize + ReLU ("parallel" axis -> shards across v7x's 2 TCs)
    out_blk = pl.pallas_call(
        bn_relu_kernel,
        grid=(T,),
        in_specs=(
            pl.BlockSpec((4, Cout, TL), lambda t: (0, 0, t)),
            pl.BlockSpec((Cout, 1), lambda t: (0, 0)),
            pl.BlockSpec((Cout, 1), lambda t: (0, 0)),
        ),
        out_specs=pl.BlockSpec((4, Cout, TL), lambda t: (0, 0, t)),
        out_shape=jax.ShapeDtypeStruct((4, Cout, L), out_dtype),
        compiler_params=pltpu.CompilerParams(
            dimension_semantics=("parallel",),
            vmem_limit_bytes=32 * 1024 * 1024,
        ),
    )(y_blk, scale, shift)

    # ---- subpixel (pixel-shuffle) de-interleave of the 4 parity planes (XLA op,
    #      output-sized; all kernel stores stayed lane-dense).
    out = out_blk.reshape(2, 2, Cout, N, H, W)
    out = jnp.transpose(out, (3, 2, 4, 0, 5, 1))       # (N, Cout, H, pr, W, pc)
    return out.reshape(N, Cout, Ho, Wo)


# ----------------------------------------------------------------------------
# Pure-JAX f32 reference (includes the conv bias -> proves its BN cancellation)
# ----------------------------------------------------------------------------
def upblock_reference(x, w, b, gamma, beta, u):
    w_sn, _ = spectral_normalize(w, u)
    # ConvTranspose2d(k=4,s=2,p=1) == lhs-dilated conv with the flipped kernel.
    w_conv = jnp.transpose(jnp.flip(w_sn, (2, 3)), (1, 0, 2, 3))   # (Cout, Cin, 4, 4)
    y = lax.conv_general_dilated(
        x, w_conv, window_strides=(1, 1), padding=((2, 2), (2, 2)),
        lhs_dilation=(2, 2), dimension_numbers=('NCHW', 'OIHW', 'NCHW'),
        precision=lax.Precision.HIGHEST)
    y = y + b[None, :, None, None]
    mean = jnp.mean(y, axis=(0, 2, 3), keepdims=True)
    var = jnp.mean((y - mean) ** 2, axis=(0, 2, 3), keepdims=True)
    y = (y - mean) * lax.rsqrt(var + 1e-5)
    y = y * gamma[None, :, None, None] + beta[None, :, None, None]
    return jnp.maximum(y, 0.0)


# ----------------------------------------------------------------------------
if __name__ == "__main__":
    key = jax.random.PRNGKey(0)
    k1, k2, k3, k4, k5, k6 = jax.random.split(key, 6)

    N, Cin, Cout, H, W = 2, 4, 8, 16, 16
    x = jax.random.normal(k1, (N, Cin, H, W), jnp.float32)
    w = jax.random.normal(k2, (Cin, Cout, 4, 4), jnp.float32) * 0.2   # ConvT weight
    b = jax.random.normal(k3, (Cout,), jnp.float32) * 0.1             # ConvT bias
    gamma = jax.random.uniform(k4, (Cout,), jnp.float32, minval=0.5, maxval=1.5)
    beta = jax.random.normal(k5, (Cout,), jnp.float32) * 0.1
    beta = beta.astype(jnp.float32)
    u = jax.random.normal(k6, (Cout,), jnp.float32)                   # spectral-norm state

    # lane_tile=256 so the demo (L = N*H*W = 512) exercises a 2-step grid and the
    # resident-accumulator path; production shapes should use >= 512 lanes/tile.
    out = jax.block_until_ready(
        upblock_forward(x, w, b, gamma, beta, u, lane_tile=256))
    assert out.shape == (N, Cout, 2 * H, 2 * W), out.shape

    ref = jax.block_until_ready(upblock_reference(x, w, b, gamma, beta, u))
    # bf16 MXU operands + bf16 pre-BN intermediate vs the f32 reference -> compare
    # at a correspondingly relaxed tolerance (stats/normalize math stays f32).
    np.testing.assert_allclose(np.asarray(out), np.asarray(ref),
                               atol=5e-2, rtol=3e-2)
    print("KERNEL_OK")
</pallas_src>

<mosaic_0001>
module attributes {stable_mosaic.version = 11 : i64} {
  func.func @conv_stats_kernel(%arg0: i32, %arg1: memref<4x16x256xbf16, #tpu.memory_space<vmem>>, %arg2: memref<4x8x16xbf16, #tpu.memory_space<vmem>>, %arg3: memref<4x8x256xbf16, #tpu.memory_space<vmem>>, %arg4: memref<8x1xf32, #tpu.memory_space<vmem>>, %arg5: memref<8x1xf32, #tpu.memory_space<vmem>>) attributes {dimension_semantics = [#tpu.dimension_semantics<arbitrary>], iteration_bounds = array<i64: 2>, scalar_prefetch = 0 : i64, scratch_operands = 0 : i64, tpu.core_type = #tpu.core_type<tc>, window_params = [{transform_indices = @transform_0, window_bounds = array<i64: 4, 16, 256>}, {pipeline_mode = #tpu.pipeline_mode<synchronous>, transform_indices = @transform_1, window_bounds = array<i64: 4, 8, 16>}, {transform_indices = @transform_2, window_bounds = array<i64: 4, 8, 256>}, {pipeline_mode = #tpu.pipeline_mode<synchronous>, transform_indices = @transform_3, window_bounds = array<i64: 8, 1>}, {pipeline_mode = #tpu.pipeline_mode<synchronous>, transform_indices = @transform_4, window_bounds = array<i64: 8, 1>}]} {
    %c0_i32 = arith.constant 0 : i32
    %0 = arith.cmpi eq, %arg0, %c0_i32 : i32
    %1 = arith.extui %0 : i1 to i32
    %c0_i32_0 = arith.constant 0 : i32
    %2 = arith.cmpi ne, %1, %c0_i32_0 : i32
    scf.if %2 {
      %cst_54 = arith.constant 0.000000e+00 : f32
      %75 = vector.broadcast %cst_54 : f32 to vector<8x1xf32>
      %c0_55 = arith.constant 0 : index
      %c0_56 = arith.constant 0 : index
      %76 = vector.load %arg4[%c0_55, %c0_56] : memref<8x1xf32, #tpu.memory_space<vmem>>, vector<8x1xf32>
      tpu.vector_store %arg4[%c0_55, %c0_56], %75 {strides = array<i32>} : memref<8x1xf32, #tpu.memory_space<vmem>>, vector<8x1xf32>,
      %cst_57 = arith.constant 0.000000e+00 : f32
      %77 = vector.broadcast %cst_57 : f32 to vector<8x1xf32>
      %c0_58 = arith.constant 0 : index
      %c0_59 = arith.constant 0 : index
      %78 = vector.load %arg5[%c0_58, %c0_59] : memref<8x1xf32, #tpu.memory_space<vmem>>, vector<8x1xf32>
      tpu.vector_store %arg5[%c0_58, %c0_59], %77 {strides = array<i32>} : memref<8x1xf32, #tpu.memory_space<vmem>>, vector<8x1xf32>,
    } else {
    }
    %cst = arith.constant 0.000000e+00 : f32
    %3 = vector.broadcast %cst : f32 to vector<8x1xf32>
    %cst_1 = arith.constant 0.000000e+00 : f32
    %4 = vector.broadcast %cst_1 : f32 to vector<8x1xf32>
    %c0 = arith.constant 0 : index
    %c0_2 = arith.constant 0 : index
    %c0_3 = arith.constant 0 : index
    %5 = vector.load %arg2[%c0, %c0_2, %c0_3] : memref<4x8x16xbf16, #tpu.memory_space<vmem>>, vector<1x8x16xbf16>
    %6 = vector.shape_cast %5 : vector<1x8x16xbf16> to vector<8x16xbf16>
    %c0_4 = arith.constant 0 : index
    %c0_5 = arith.constant 0 : index
    %c0_6 = arith.constant 0 : index
    %7 = vector.load %arg1[%c0_4, %c0_5, %c0_6] : memref<4x16x256xbf16, #tpu.memory_space<vmem>>, vector<1x16x256xbf16>
    %8 = vector.shape_cast %7 : vector<1x16x256xbf16> to vector<16x256xbf16>
    %cst_7 = arith.constant dense<0.000000e+00> : vector<8x256xf32>
    %9 = tpu.matmul %6, %8, %cst_7 {dimension_numbers = #tpu.dot_dimension_numbers<[1], [0], [0], [1], [0, 0, 1, 1], [], []>} : vector<8x16xbf16>, vector<16x256xbf16>, vector<8x256xf32> -> vector<8x256xf32>
    %cst_8 = arith.constant dense<0.000000e+00> : vector<8xf32>
    %10 = vector.multi_reduction <add>, %9, %cst_8 [1] : vector<8x256xf32> to vector<8xf32>
    %11 = vector.shape_cast %10 : vector<8xf32> to vector<8x1xf32>
    %12 = arith.addf %3, %11 : vector<8x1xf32>
    %13 = arith.mulf %9, %9 : vector<8x256xf32>
    %cst_9 = arith.constant dense<0.000000e+00> : vector<8xf32>
    %14 = vector.multi_reduction <add>, %13, %cst_9 [1] : vector<8x256xf32> to vector<8xf32>
    %15 = vector.shape_cast %14 : vector<8xf32> to vector<8x1xf32>
    %16 = arith.addf %4, %15 : vector<8x1xf32>
    %17 = arith.truncf %9 : vector<8x256xf32> to vector<8x256xbf16>
    %c0_10 = arith.constant 0 : index
    %c0_11 = arith.constant 0 : index
    %c0_12 = arith.constant 0 : index
    %18 = vector.load %arg3[%c0_10, %c0_11, %c0_12] : memref<4x8x256xbf16, #tpu.memory_space<vmem>>, vector<1x8x256xbf16>
    %19 = vector.shape_cast %18 : vector<1x8x256xbf16> to vector<8x256xbf16>
    %20 = vector.shape_cast %17 : vector<8x256xbf16> to vector<1x8x256xbf16>
    tpu.vector_store %arg3[%c0_10, %c0_11, %c0_12], %20 {strides = array<i32>} : memref<4x8x256xbf16, #tpu.memory_space<vmem>>, vector<1x8x256xbf16>,
    %c1 = arith.constant 1 : index
    %c0_13 = arith.constant 0 : index
    %c0_14 = arith.constant 0 : index
    %21 = vector.load %arg2[%c1, %c0_13, %c0_14] : memref<4x8x16xbf16, #tpu.memory_space<vmem>>, vector<1x8x16xbf16>
    %22 = vector.shape_cast %21 : vector<1x8x16xbf16> to vector<8x16xbf16>
    %c1_15 = arith.constant 1 : index
    %c0_16 = arith.constant 0 : index
    %c0_17 = arith.constant 0 : index
    %23 = vector.load %arg1[%c1_15, %c0_16, %c0_17] : memref<4x16x256xbf16, #tpu.memory_space<vmem>>, vector<1x16x256xbf16>
    %24 = vector.shape_cast %23 : vector<1x16x256xbf16> to vector<16x256xbf16>
    %cst_18 = arith.constant dense<0.000000e+00> : vector<8x256xf32>
    %25 = tpu.matmul %22, %24, %cst_18 {dimension_numbers = #tpu.dot_dimension_numbers<[1], [0], [0], [1], [0, 0, 1, 1], [], []>} : vector<8x16xbf16>, vector<16x256xbf16>, vector<8x256xf32> -> vector<8x256xf32>
    %cst_19 = arith.constant dense<0.000000e+00> : vector<8xf32>
    %26 = vector.multi_reduction <add>, %25, %cst_19 [1] : vector<8x256xf32> to vector<8xf32>
    %27 = vector.shape_cast %26 : vector<8xf32> to vector<8x1xf32>
    %28 = arith.addf %12, %27 : vector<8x1xf32>
    %29 = arith.mulf %25, %25 : vector<8x256xf32>
    %cst_20 = arith.constant dense<0.000000e+00> : vector<8xf32>
    %30 = vector.multi_reduction <add>, %29, %cst_20 [1] : vector<8x256xf32> to vector<8xf32>
    %31 = vector.shape_cast %30 : vector<8xf32> to vector<8x1xf32>
    %32 = arith.addf %16, %31 : vector<8x1xf32>
    %33 = arith.truncf %25 : vector<8x256xf32> to vector<8x256xbf16>
    %c1_21 = arith.constant 1 : index
    %c0_22 = arith.constant 0 : index
    %c0_23 = arith.constant 0 : index
    %34 = vector.load %arg3[%c1_21, %c0_22, %c0_23] : memref<4x8x256xbf16, #tpu.memory_space<vmem>>, vector<1x8x256xbf16>
    %35 = vector.shape_cast %34 : vector<1x8x256xbf16> to vector<8x256xbf16>
    %36 = vector.shape_cast %33 : vector<8x256xbf16> to vector<1x8x256xbf16>
    tpu.vector_store %arg3[%c1_21, %c0_22, %c0_23], %36 {strides = array<i32>} : memref<4x8x256xbf16, #tpu.memory_space<vmem>>, vector<1x8x256xbf16>,
    %c2 = arith.constant 2 : index
    %c0_24 = arith.constant 0 : index
    %c0_25 = arith.constant 0 : index
    %37 = vector.load %arg2[%c2, %c0_24, %c0_25] : memref<4x8x16xbf16, #tpu.memory_space<vmem>>, vector<1x8x16xbf16>
    %38 = vector.shape_cast %37 : vector<1x8x16xbf16> to vector<8x16xbf16>
    %c2_26 = arith.constant 2 : index
    %c0_27 = arith.constant 0 : index
    %c0_28 = arith.constant 0 : index
    %39 = vector.load %arg1[%c2_26, %c0_27, %c0_28] : memref<4x16x256xbf16, #tpu.memory_space<vmem>>, vector<1x16x256xbf16>
    %40 = vector.shape_cast %39 : vector<1x16x256xbf16> to vector<16x256xbf16>
    %cst_29 = arith.constant dense<0.000000e+00> : vector<8x256xf32>
    %41 = tpu.matmul %38, %40, %cst_29 {dimension_numbers = #tpu.dot_dimension_numbers<[1], [0], [0], [1], [0, 0, 1, 1], [], []>} : vector<8x16xbf16>, vector<16x256xbf16>, vector<8x256xf32> -> vector<8x256xf32>
    %cst_30 = arith.constant dense<0.000000e+00> : vector<8xf32>
    %42 = vector.multi_reduction <add>, %41, %cst_30 [1] : vector<8x256xf32> to vector<8xf32>
    %43 = vector.shape_cast %42 : vector<8xf32> to vector<8x1xf32>
    %44 = arith.addf %28, %43 : vector<8x1xf32>
    %45 = arith.mulf %41, %41 : vector<8x256xf32>
    %cst_31 = arith.constant dense<0.000000e+00> : vector<8xf32>
    %46 = vector.multi_reduction <add>, %45, %cst_31 [1] : vector<8x256xf32> to vector<8xf32>
    %47 = vector.shape_cast %46 : vector<8xf32> to vector<8x1xf32>
    %48 = arith.addf %32, %47 : vector<8x1xf32>
    %49 = arith.truncf %41 : vector<8x256xf32> to vector<8x256xbf16>
    %c2_32 = arith.constant 2 : index
    %c0_33 = arith.constant 0 : index
    %c0_34 = arith.constant 0 : index
    %50 = vector.load %arg3[%c2_32, %c0_33, %c0_34] : memref<4x8x256xbf16, #tpu.memory_space<vmem>>, vector<1x8x256xbf16>
    %51 = vector.shape_cast %50 : vector<1x8x256xbf16> to vector<8x256xbf16>
    %52 = vector.shape_cast %49 : vector<8x256xbf16> to vector<1x8x256xbf16>
    tpu.vector_store %arg3[%c2_32, %c0_33, %c0_34], %52 {strides = array<i32>} : memref<4x8x256xbf16, #tpu.memory_space<vmem>>, vector<1x8x256xbf16>,
    %c3 = arith.constant 3 : index
    %c0_35 = arith.constant 0 : index
    %c0_36 = arith.constant 0 : index
    %53 = vector.load %arg2[%c3, %c0_35, %c0_36] : memref<4x8x16xbf16, #tpu.memory_space<vmem>>, vector<1x8x16xbf16>
    %54 = vector.shape_cast %53 : vector<1x8x16xbf16> to vector<8x16xbf16>
    %c3_37 = arith.constant 3 : index
    %c0_38 = arith.constant 0 : index
    %c0_39 = arith.constant 0 : index
    %55 = vector.load %arg1[%c3_37, %c0_38, %c0_39] : memref<4x16x256xbf16, #tpu.memory_space<vmem>>, vector<1x16x256xbf16>
    %56 = vector.shape_cast %55 : vector<1x16x256xbf16> to vector<16x256xbf16>
    %cst_40 = arith.constant dense<0.000000e+00> : vector<8x256xf32>
    %57 = tpu.matmul %54, %56, %cst_40 {dimension_numbers = #tpu.dot_dimension_numbers<[1], [0], [0], [1], [0, 0, 1, 1], [], []>} : vector<8x16xbf16>, vector<16x256xbf16>, vector<8x256xf32> -> vector<8x256xf32>
    %cst_41 = arith.constant dense<0.000000e+00> : vector<8xf32>
    %58 = vector.multi_reduction <add>, %57, %cst_41 [1] : vector<8x256xf32> to vector<8xf32>
    %59 = vector.shape_cast %58 : vector<8xf32> to vector<8x1xf32>
    %60 = arith.addf %44, %59 : vector<8x1xf32>
    %61 = arith.mulf %57, %57 : vector<8x256xf32>
    %cst_42 = arith.constant dense<0.000000e+00> : vector<8xf32>
    %62 = vector.multi_reduction <add>, %61, %cst_42 [1] : vector<8x256xf32> to vector<8xf32>
    %63 = vector.shape_cast %62 : vector<8xf32> to vector<8x1xf32>
    %64 = arith.addf %48, %63 : vector<8x1xf32>
    %65 = arith.truncf %57 : vector<8x256xf32> to vector<8x256xbf16>
    %c3_43 = arith.constant 3 : index
    %c0_44 = arith.constant 0 : index
    %c0_45 = arith.constant 0 : index
    %66 = vector.load %arg3[%c3_43, %c0_44, %c0_45] : memref<4x8x256xbf16, #tpu.memory_space<vmem>>, vector<1x8x256xbf16>
    %67 = vector.shape_cast %66 : vector<1x8x256xbf16> to vector<8x256xbf16>
    %68 = vector.shape_cast %65 : vector<8x256xbf16> to vector<1x8x256xbf16>
    tpu.vector_store %arg3[%c3_43, %c0_44, %c0_45], %68 {strides = array<i32>} : memref<4x8x256xbf16, #tpu.memory_space<vmem>>, vector<1x8x256xbf16>,
    %c0_46 = arith.constant 0 : index
    %c0_47 = arith.constant 0 : index
    %69 = vector.load %arg4[%c0_46, %c0_47] : memref<8x1xf32, #tpu.memory_space<vmem>>, vector<8x1xf32>
    %70 = arith.addf %69, %60 : vector<8x1xf32>
    %c0_48 = arith.constant 0 : index
    %c0_49 = arith.constant 0 : index
    %71 = vector.load %arg4[%c0_48, %c0_49] : memref<8x1xf32, #tpu.memory_space<vmem>>, vector<8x1xf32>
    tpu.vector_store %arg4[%c0_48, %c0_49], %70 {strides = array<i32>} : memref<8x1xf32, #tpu.memory_space<vmem>>, vector<8x1xf32>,
    %c0_50 = arith.constant 0 : index
    %c0_51 = arith.constant 0 : index
    %72 = vector.load %arg5[%c0_50, %c0_51] : memref<8x1xf32, #tpu.memory_space<vmem>>, vector<8x1xf32>
    %73 = arith.addf %72, %64 : vector<8x1xf32>
    %c0_52 = arith.constant 0 : index
    %c0_53 = arith.constant 0 : index
    %74 = vector.load %arg5[%c0_52, %c0_53] : memref<8x1xf32, #tpu.memory_space<vmem>>, vector<8x1xf32>
    tpu.vector_store %arg5[%c0_52, %c0_53], %73 {strides = array<i32>} : memref<8x1xf32, #tpu.memory_space<vmem>>, vector<8x1xf32>,
    return
  }
  func.func @transform_0(%arg0: i32) -> (i32, i32, i32) {
    %c0_i32 = arith.constant 0 : i32
    %c0_i32_0 = arith.constant 0 : i32
    %c0_i32_1 = arith.constant 0 : i32
    return %c0_i32, %c0_i32_0, %arg0 : i32, i32, i32
  }
  func.func @transform_1(%arg0: i32) -> (i32, i32, i32) {
    %c0_i32 = arith.constant 0 : i32
    %c0_i32_0 = arith.constant 0 : i32
    %c0_i32_1 = arith.constant 0 : i32
    %c0_i32_2 = arith.constant 0 : i32
    return %c0_i32, %c0_i32_0, %c0_i32_1 : i32, i32, i32
  }
  func.func @transform_2(%arg0: i32) -> (i32, i32, i32) {
    %c0_i32 = arith.constant 0 : i32
    %c0_i32_0 = arith.constant 0 : i32
    %c0_i32_1 = arith.constant 0 : i32
    return %c0_i32, %c0_i32_0, %arg0 : i32, i32, i32
  }
  func.func @transform_3(%arg0: i32) -> (i32, i32) {
    %c0_i32 = arith.constant 0 : i32
    %c0_i32_0 = arith.constant 0 : i32
    %c0_i32_1 = arith.constant 0 : i32
    return %c0_i32, %c0_i32_0 : i32, i32
  }
  func.func @transform_4(%arg0: i32) -> (i32, i32) {
    %c0_i32 = arith.constant 0 : i32
    %c0_i32_0 = arith.constant 0 : i32
    %c0_i32_1 = arith.constant 0 : i32
    return %c0_i32, %c0_i32_0 : i32, i32
  }
}

module attributes {stable_mosaic.version = 11 : i64} {
  func.func @bn_relu_kernel(%arg0: i32, %arg1: memref<4x8x256xbf16, #tpu.memory_space<vmem>>, %arg2: memref<8x1xf32, #tpu.memory_space<vmem>>, %arg3: memref<8x1xf32, #tpu.memory_space<vmem>>, %arg4: memref<4x8x256xf32, #tpu.memory_space<vmem>>) attributes {dimension_semantics = [#tpu.dimension_semantics<parallel>], iteration_bounds = array<i64: 2>, scalar_prefetch = 0 : i64, scratch_operands = 0 : i64, tpu.core_type = #tpu.core_type<tc>, window_params = [{transform_indices = @transform_0, window_bounds = array<i64: 4, 8, 256>}, {pipeline_mode = #tpu.pipeline_mode<synchronous>, transform_indices = @transform_1, window_bounds = array<i64: 8, 1>}, {pipeline_mode = #tpu.pipeline_mode<synchronous>, transform_indices = @transform_2, window_bounds = array<i64: 8, 1>}, {transform_indices = @transform_3, window_bounds = array<i64: 4, 8, 256>}]} {
    %c0 = arith.constant 0 : index
    %c0_0 = arith.constant 0 : index
    %c0_1 = arith.constant 0 : index
    %0 = vector.load %arg1[%c0, %c0_0, %c0_1] : memref<4x8x256xbf16, #tpu.memory_space<vmem>>, vector<4x8x256xbf16>
    %1 = arith.extf %0 : vector<4x8x256xbf16> to vector<4x8x256xf32>
    %c0_2 = arith.constant 0 : index
    %c0_3 = arith.constant 0 : index
    %2 = vector.load %arg2[%c0_2, %c0_3] : memref<8x1xf32, #tpu.memory_space<vmem>>, vector<8x1xf32>
    %3 = vector.shape_cast %2 : vector<8x1xf32> to vector<1x8x1xf32>
    %4 = vector.broadcast %3 : vector<1x8x1xf32> to vector<4x8x256xf32>
    %5 = arith.mulf %1, %4 : vector<4x8x256xf32>
    %c0_4 = arith.constant 0 : index
    %c0_5 = arith.constant 0 : index
    %6 = vector.load %arg3[%c0_4, %c0_5] : memref<8x1xf32, #tpu.memory_space<vmem>>, vector<8x1xf32>
    %7 = vector.shape_cast %6 : vector<8x1xf32> to vector<1x8x1xf32>
    %8 = vector.broadcast %7 : vector<1x8x1xf32> to vector<4x8x256xf32>
    %9 = arith.addf %5, %8 : vector<4x8x256xf32>
    %cst = arith.constant 0.000000e+00 : f32
    %10 = vector.broadcast %cst : f32 to vector<4x8x256xf32>
    %11 = arith.maximumf %9, %10 : vector<4x8x256xf32>
    %c0_6 = arith.constant 0 : index
    %c0_7 = arith.constant 0 : index
    %c0_8 = arith.constant 0 : index
    %12 = vector.load %arg4[%c0_6, %c0_7, %c0_8] : memref<4x8x256xf32, #tpu.memory_space<vmem>>, vector<4x8x256xf32>
    tpu.vector_store %arg4[%c0_6, %c0_7, %c0_8], %11 {strides = array<i32>} : memref<4x8x256xf32, #tpu.memory_space<vmem>>, vector<4x8x256xf32>,
    return
  }
  func.func @transform_0(%arg0: i32) -> (i32, i32, i32) {
    %c0_i32 = arith.constant 0 : i32
    %c0_i32_0 = arith.constant 0 : i32
    %c0_i32_1 = arith.constant 0 : i32
    return %c0_i32, %c0_i32_0, %arg0 : i32, i32, i32
  }
  func.func @transform_1(%arg0: i32) -> (i32, i32) {
    %c0_i32 = arith.constant 0 : i32
    %c0_i32_0 = arith.constant 0 : i32
    %c0_i32_1 = arith.constant 0 : i32
    return %c0_i32, %c0_i32_0 : i32, i32
  }
  func.func @transform_2(%arg0: i32) -> (i32, i32) {
    %c0_i32 = arith.constant 0 : i32
    %c0_i32_0 = arith.constant 0 : i32
    %c0_i32_1 = arith.constant 0 : i32
    return %c0_i32, %c0_i32_0 : i32, i32
  }
  func.func @transform_3(%arg0: i32) -> (i32, i32, i32) {
    %c0_i32 = arith.constant 0 : i32
    %c0_i32_0 = arith.constant 0 : i32
    %c0_i32_1 = arith.constant 0 : i32
    return %c0_i32, %c0_i32_0, %arg0 : i32, i32, i32
  }
}

</mosaic_0001>

<bundles_post_ra>
// kernel: reverse
= control target key start
LH: loop header
LB: loop body
LE: loop exit
PB: predicated region body
PF: predicated region fallthrough
CT: control target
= control target key end

     0   :  { %v111_v16 = vld [vmem:[#allocation1 + $0x78] sm:$0xf]  ;;  %v121_v17 = vld [vmem:[#allocation1 + $0x70] sm:$0xf]  ;;  %v131_v18 = vld [vmem:[#allocation1 + $0x68] sm:$0xf]  ;;  %v269_v39 = vlaneseq  ;;  %s891_s0 = inlined_call_operand.vmem [shape: f32[4,8,4,4], index: 0, kind: input, shape index: {}]   ;;  %s892_s1 = inlined_call_operand.vmem [shape: f32[4,8,4,4], index: 1, kind: output, shape index: {}]  }
   0x1   :  { %v18_v0 = vld [vmem:[%s891_s0] sm:$0xf]  ;;  %v20_v1 = vld [vmem:[%s891_s0 + $0x4] sm:$0xf]  ;;  %v22_v2 = vld [vmem:[%s891_s0 + $0x8] sm:$0xf] }
   0x2   :  { %19 = vst [vmem:[#allocation1 + $0x4] sm:$0xf] %v18_v0  ;;  %21 = vst [vmem:[#allocation1 + $0xc] sm:$0xf] %v20_v1  ;;  %v24_v3 = vld [vmem:[%s891_s0 + $0xc] sm:$0xf] }
   0x3   :  { %23 = vst [vmem:[#allocation1 + $0x14] sm:$0xf] %v22_v2  ;;  %v26_v4 = vld [vmem:[%s891_s0 + $0x10] sm:$0xf]  ;;  %v28_v5 = vld [vmem:[%s891_s0 + $0x14] sm:$0xf] }
   0x4   :  { %25 = vst [vmem:[#allocation1 + $0x1c] sm:$0xf] %v24_v3  ;;  %27 = vst [vmem:[#allocation1 + $0x24] sm:$0xf] %v26_v4  ;;  %v30_v6 = vld [vmem:[%s891_s0 + $0x18] sm:$0xf] }
   0x5   :  { %29 = vst [vmem:[#allocation1 + $0x2c] sm:$0xf] %v28_v5  ;;  %v32_v7 = vld [vmem:[%s891_s0 + $0x1c] sm:$0xf]  ;;  %v34_v8 = vld [vmem:[%s891_s0 + $0x20] sm:$0xf] }
   0x6   :  { %31 = vst [vmem:[#allocation1 + $0x34] sm:$0xf] %v30_v6  ;;  %33 = vst [vmem:[#allocation1 + $0x3c] sm:$0xf] %v32_v7  ;;  %v36_v9 = vld [vmem:[%s891_s0 + $0x24] sm:$0xf] }
   0x7   :  { %35 = vst [vmem:[#allocation1 + $0x44] sm:$0xf] %v34_v8  ;;  %v38_v10 = vld [vmem:[%s891_s0 + $0x28] sm:$0xf]  ;;  %v40_v11 = vld [vmem:[%s891_s0 + $0x2c] sm:$0xf] }
   0x8   :  { %37 = vst [vmem:[#allocation1 + $0x4c] sm:$0xf] %v36_v9  ;;  %39 = vst [vmem:[#allocation1 + $0x54] sm:$0xf] %v38_v10  ;;  %v42_v12 = vld [vmem:[%s891_s0 + $0x30] sm:$0xf] }
   0x9   :  { %41 = vst [vmem:[#allocation1 + $0x5c] sm:$0xf] %v40_v11  ;;  %v44_v13 = vld [vmem:[%s891_s0 + $0x34] sm:$0xf]  ;;  %v46_v14 = vld [vmem:[%s891_s0 + $0x38] sm:$0xf] }
   0xa   :  { %43 = vst [vmem:[#allocation1 + $0x64] sm:$0xf] %v42_v12  ;;  %45 = vst [vmem:[#allocation1 + $0x6c] sm:$0xf] %v44_v13  ;;  %v48_v15 = vld [vmem:[%s891_s0 + $0x3c] sm:$0xf] }
   0xb   :  { %47 = vst [vmem:[#allocation1 + $0x74] sm:$0xf] %v46_v14  ;;  %49 = vst [vmem:[#allocation1 + $0x7c] sm:$0xf] %v48_v15  ;;  %v141_v19 = vld [vmem:[#allocation1 + $0x60] sm:$0xf] }
   0xc   :  { %113 = vst [vmem:[#allocation0 + $0xf0] sm:$0xf] %v111_v16  ;;  %123 = vst [vmem:[#allocation0 + $0xe0] sm:$0xf] %v121_v17  ;;  %v151_v20 = vld [vmem:[#allocation1 + $0x58] sm:$0xf] }
   0xd   :  { %133 = vst [vmem:[#allocation0 + $0xd0] sm:$0xf] %v131_v18  ;;  %143 = vst [vmem:[#allocation0 + $0xc0] sm:$0xf] %v141_v19  ;;  %v161_v21 = vld [vmem:[#allocation1 + $0x50] sm:$0xf] }
   0xe   :  { %153 = vst [vmem:[#allocation0 + $0xb0] sm:$0xf] %v151_v20  ;;  %v171_v22 = vld [vmem:[#allocation1 + $0x48] sm:$0xf]  ;;  %v181_v23 = vld [vmem:[#allocation1 + $0x40] sm:$0xf] }
   0xf   :  { %163 = vst [vmem:[#allocation0 + $0xa0] sm:$0xf] %v161_v21  ;;  %173 = vst [vmem:[#allocation0 + $0x90] sm:$0xf] %v171_v22  ;;  %v191_v24 = vld [vmem:[#allocation1 + $0x38] sm:$0xf] }
  0x10   :  { %183 = vst [vmem:[#allocation0 + $0x80] sm:$0xf] %v181_v23  ;;  %v201_v25 = vld [vmem:[#allocation1 + $0x30] sm:$0xf]  ;;  %v211_v26 = vld [vmem:[#allocation1 + $0x28] sm:$0xf] }
  0x11   :  { %193 = vst [vmem:[#allocation0 + $0x70] sm:$0xf] %v191_v24  ;;  %203 = vst [vmem:[#allocation0 + $0x60] sm:$0xf] %v201_v25  ;;  %v206_v27 = vld [vmem:[#allocation1 + $0x2c] sm:$0xf] }
  0x12   :  { %213 = vst [vmem:[#allocation0 + $0x50] sm:$0xf] %v211_v26  ;;  %v216_v28 = vld [vmem:[#allocation1 + $0x24] sm:$0xf]  ;;  %v221_v29 = vld [vmem:[#allocation1 + $0x20] sm:$0xf] }
  0x13   :  { %v176_v30 = vld [vmem:[#allocation1 + $0x44] sm:$0xf]  ;;  %v186_v31 = vld [vmem:[#allocation1 + $0x3c] sm:$0xf]  ;;  %v196_v32 = vld [vmem:[#allocation1 + $0x34] sm:$0xf] }
  0x14   :  { %208 = vst [vmem:[#allocation0 + $0x58] sm:$0xf] %v206_v27  ;;  %218 = vst [vmem:[#allocation0 + $0x48] sm:$0xf] %v216_v28  ;;  %v146_v33 = vld [vmem:[#allocation1 + $0x5c] sm:$0xf] }
  0x15   :  { %223 = vst [vmem:[#allocation0 + $0x40] sm:$0xf] %v221_v29  ;;  %v156_v34 = vld [vmem:[#allocation1 + $0x54] sm:$0xf]  ;;  %v166_v35 = vld [vmem:[#allocation1 + $0x4c] sm:$0xf] }
  0x16   :  { %178 = vst [vmem:[#allocation0 + $0x88] sm:$0xf] %v176_v30  ;;  %188 = vst [vmem:[#allocation0 + $0x78] sm:$0xf] %v186_v31  ;;  %v116_v36 = vld [vmem:[#allocation1 + $0x74] sm:$0xf] }
  0x17   :  { %198 = vst [vmem:[#allocation0 + $0x68] sm:$0xf] %v196_v32  ;;  %v126_v37 = vld [vmem:[#allocation1 + $0x6c] sm:$0xf]  ;;  %v136_v38 = vld [vmem:[#allocation1 + $0x64] sm:$0xf] }
  0x18   :  { %148 = vst [vmem:[#allocation0 + $0xb8] sm:$0xf] %v146_v33  ;;  %158 = vst [vmem:[#allocation0 + $0xa8] sm:$0xf] %v156_v34  ;;  %v106_v40 = vld [vmem:[#allocation1 + $0x7c] sm:$0xf] }
  0x19   :  { %168 = vst [vmem:[#allocation0 + $0x98] sm:$0xf] %v166_v35  ;;  %118 = vst [vmem:[#allocation0 + $0xe8] sm:$0xf] %v116_v36  ;;  %v226_v41 = vld [vmem:[#allocation1 + $0x1c] sm:$0xf] }
  0x1a   :  { %128 = vst [vmem:[#allocation0 + $0xd8] sm:$0xf] %v126_v37  ;;  %138 = vst [vmem:[#allocation0 + $0xc8] sm:$0xf] %v136_v38  ;;  %v231_v42 = vld [vmem:[#allocation1 + $0x18] sm:$0xf] }
  0x1b   :  { %108 = vst [vmem:[#allocation0 + $0xf8] sm:$0xf] %v106_v40  ;;  %228 = vst [vmem:[#allocation0 + $0x38] sm:$0xf] %v226_v41  ;;  %v236_v43 = vld [vmem:[#allocation1 + $0x14] sm:$0xf] }
  0x1c   :  { %233 = vst [vmem:[#allocation0 + $0x30] sm:$0xf] %v231_v42  ;;  %v241_v44 = vld [vmem:[#allocation1 + $0x10] sm:$0xf]  ;;  %v246_v45 = vld [vmem:[#allocation1 + $0xc] sm:$0xf] }
  0x1d   :  { %238 = vst [vmem:[#allocation0 + $0x28] sm:$0xf] %v236_v43  ;;  %243 = vst [vmem:[#allocation0 + $0x20] sm:$0xf] %v241_v44  ;;  %v251_v46 = vld [vmem:[#allocation1 + $0x8] sm:$0xf] }
  0x1e   :  { %248 = vst [vmem:[#allocation0 + $0x18] sm:$0xf] %v246_v45  ;;  %v255_v47 = vld [vmem:[#allocation1 + $0x4] sm:$0xf]  ;;  %v258_v48 = vld [vmem:[#allocation1] sm:$0xf] }
  0x1f   :  { %253 = vst [vmem:[#allocation0 + $0x10] sm:$0xf] %v251_v46  ;;  %257 = vst [vmem:[#allocation0 + $0x8] sm:$0xf] %v255_v47  ;;  %v832_v49 = vshrl.u32 %v269_v39, 7 }
  0x20   :  { %259 = vst [vmem:[#allocation0] sm:$0xf] %v258_v48  ;;  %v317_v50 = vld [vmem:[#allocation0 + $0x77] ss:$-1 sm:$0xff]  ;;  %v331_v51 = vld [vmem:[#allocation0 + $0x67] ss:$-1 sm:$0xff] }
  0x21   :  { %v318_v52 = vrot.slane %v317_v50, 4  ;;  %v332_v53 = vrot.slane %v331_v51, 4  ;;  %v345_v54 = vld [vmem:[#allocation0 + $0x57] ss:$-1 sm:$0xff]  ;;  %v350_v55 = vld [vmem:[#allocation0 + $0x5f] ss:$-1 sm:$0xff] }
  0x22   :  { %vm271_vm0 = vcmp.lt.s32.totalorder %v832_v49, 4  ;;  %v322_v56 = vld [vmem:[#allocation0 + $0x7f] ss:$-1 sm:$0xff]  ;;  %v336_v57 = vld [vmem:[#allocation0 + $0x6f] ss:$-1 sm:$0xff]  ;;  %v346_v58 = vrot.slane %v345_v54, 4 }
  0x23   :  { %319 = vst [vmem:[#allocation2 + $0x20] sm:$0xff] %v318_v52  ;;  %v323_v59 = vrot.slane %v322_v56, 4  ;;  %333 = vst [vmem:[#allocation2 + $0x28] sm:$0xff] %v332_v53  ;;  %v337_v60 = vrot.slane %v336_v57, 4  ;;  %v351_v61 = vrot.slane %v350_v55, 4 }
  0x24   :  { %v359_v62 = vld [vmem:[#allocation0 + $0x47] ss:$-1 sm:$0xff]  ;;  %347 = vst [vmem:[#allocation2 + $0x30] sm:$0xff] %v346_v58  ;;  %v364_v0 = vld [vmem:[#allocation0 + $0x4f] ss:$-1 sm:$0xff] }
  0x25   :  { %v360_v63 = vrot.slane %v359_v62, 4  ;;  %v373_v1 = vld [vmem:[#allocation0 + $0xb7] ss:$-1 sm:$0xff]  ;;  %v267_v3 = vld [vmem:[#allocation0 + $0x3f] ss:$-1 sm:$0xff]  ;;  %327 = vst.msk [vmem:[#allocation2 + $0x20] sm:$0xff] %vm271_vm0, %v323_v59 }
  0x26   :  { %v262_v2 = vld [vmem:[#allocation0 + $0x37] ss:$-1 sm:$0xff]  ;;  %341 = vst.msk [vmem:[#allocation2 + $0x28] sm:$0xff] %vm271_vm0, %v337_v60  ;;  %355 = vst.msk [vmem:[#allocation2 + $0x30] sm:$0xff] %vm271_vm0, %v351_v61  ;;  %v365_v4 = vrot.slane %v364_v0, 4  ;;  %v374_v5 = vrot.slane %v373_v1, 4 }
  0x27   :  { %v263_v6 = vrot.slane %v262_v2, 4  ;;  %v268_v7 = vrot.slane %v267_v3, 4  ;;  %v276_v8 = vld [vmem:[#allocation0 + $0x27] ss:$-1 sm:$0xff]  ;;  %v281_v9 = vld [vmem:[#allocation0 + $0x2f] ss:$-1 sm:$0xff] }
  0x28   :  { %361 = vst [vmem:[#allocation2 + $0x38] sm:$0xff] %v360_v63  ;;  %v277_v10 = vrot.slane %v276_v8, 4  ;;  %v282_v11 = vrot.slane %v281_v9, 4  ;;  %v290_v12 = vld [vmem:[#allocation0 + $0x17] ss:$-1 sm:$0xff]  ;;  %375 = vst [vmem:[#allocation2 + $0x40] sm:$0xff] %v374_v5 }
  0x29   :  { %v295_v13 = vld [vmem:[#allocation0 + $0x1f] ss:$-1 sm:$0xff]  ;;  %369 = vst.msk [vmem:[#allocation2 + $0x38] sm:$0xff] %vm271_vm0, %v365_v4  ;;  %264 = vst [vmem:[#allocation2] sm:$0xff] %v263_v6  ;;  %v291_v14 = vrot.slane %v290_v12, 4 }
  0x2a   :  { %v296_v15 = vrot.slane %v295_v13, 4  ;;  %v303_v16 = vld [vmem:[#allocation0 + $0x7] ss:$-1 sm:$0xff]  ;;  %v308_v17 = vld [vmem:[#allocation0 + $0xf] ss:$-1 sm:$0xff]  ;;  %272 = vst.msk [vmem:[#allocation2] sm:$0xff] %vm271_vm0, %v268_v7 }
  0x2b   :  { %278 = vst [vmem:[#allocation2 + $0x8] sm:$0xff] %v277_v10  ;;  %v304_v18 = vrot.slane %v303_v16, 4  ;;  %v309_v19 = vrot.slane %v308_v17, 4  ;;  %v378_v20 = vld [vmem:[#allocation0 + $0xbf] ss:$-1 sm:$0xff]  ;;  %292 = vst [vmem:[#allocation2 + $0x10] sm:$0xff] %v291_v14 }
  0x2c   :  { %v387_v21 = vld [vmem:[#allocation0 + $0xa7] ss:$-1 sm:$0xff]  ;;  %286 = vst.msk [vmem:[#allocation2 + $0x8] sm:$0xff] %vm271_vm0, %v282_v11  ;;  %v379_v22 = vrot.slane %v378_v20, 4  ;;  %v392_v24 = vld [vmem:[#allocation0 + $0xaf] ss:$-1 sm:$0xff] }
  0x2d   :  { %v388_v23 = vrot.slane %v387_v21, 4  ;;  %v401_v25 = vld [vmem:[#allocation0 + $0x97] ss:$-1 sm:$0xff]  ;;  %300 = vst.msk [vmem:[#allocation2 + $0x10] sm:$0xff] %vm271_vm0, %v296_v15  ;;  %305 = vst [vmem:[#allocation2 + $0x18] sm:$0xff] %v304_v18  ;;  %v393_v26 = vrot.slane %v392_v24, 4 }
  0x2e   :  { %v402_v27 = vrot.slane %v401_v25, 4  ;;  %v406_v28 = vld [vmem:[#allocation0 + $0x9f] ss:$-1 sm:$0xff]  ;;  %v415_v29 = vld [vmem:[#allocation0 + $0x87] ss:$-1 sm:$0xff]  ;;  %313 = vst.msk [vmem:[#allocation2 + $0x18] sm:$0xff] %vm271_vm0, %v309_v19 }
  0x2f   :  { %383 = vst.msk [vmem:[#allocation2 + $0x40] sm:$0xff] %vm271_vm0, %v379_v22  ;;  %389 = vst [vmem:[#allocation2 + $0x48] sm:$0xff] %v388_v23  ;;  %v407_v30 = vrot.slane %v406_v28, 4  ;;  %v416_v31 = vrot.slane %v415_v29, 4  ;;  %v420_v32 = vld [vmem:[#allocation0 + $0x8f] ss:$-1 sm:$0xff] }
  0x30   :  { %v429_v33 = vld [vmem:[#allocation0 + $0xf7] ss:$-1 sm:$0xff]  ;;  %397 = vst.msk [vmem:[#allocation2 + $0x48] sm:$0xff] %vm271_vm0, %v393_v26  ;;  %403 = vst [vmem:[#allocation2 + $0x50] sm:$0xff] %v402_v27  ;;  %v421_v34 = vrot.slane %v420_v32, 4 }
  0x31   :  { %v430_v35 = vrot.slane %v429_v33, 4  ;;  %v434_v36 = vld [vmem:[#allocation0 + $0xff] ss:$-1 sm:$0xff]  ;;  %v443_v37 = vld [vmem:[#allocation0 + $0xe7] ss:$-1 sm:$0xff]  ;;  %411 = vst.msk [vmem:[#allocation2 + $0x50] sm:$0xff] %vm271_vm0, %v407_v30 }
  0x32   :  { %417 = vst [vmem:[#allocation2 + $0x58] sm:$0xff] %v416_v31  ;;  %v435_v38 = vrot.slane %v434_v36, 4  ;;  %v444_v39 = vrot.slane %v443_v37, 4  ;;  %v448_v40 = vld [vmem:[#allocation0 + $0xef] ss:$-1 sm:$0xff] }
  0x33   :  { %v457_v41 = vld [vmem:[#allocation0 + $0xd7] ss:$-1 sm:$0xff]  ;;  %425 = vst.msk [vmem:[#allocation2 + $0x58] sm:$0xff] %vm271_vm0, %v421_v34  ;;  %431 = vst [vmem:[#allocation2 + $0x60] sm:$0xff] %v430_v35  ;;  %v449_v42 = vrot.slane %v448_v40, 4 }
  0x34   :  { %v458_v43 = vrot.slane %v457_v41, 4  ;;  %v462_v44 = vld [vmem:[#allocation0 + $0xdf] ss:$-1 sm:$0xff]  ;;  %v471_v45 = vld [vmem:[#allocation0 + $0xc7] ss:$-1 sm:$0xff]  ;;  %439 = vst.msk [vmem:[#allocation2 + $0x60] sm:$0xff] %vm271_vm0, %v435_v38 }
  0x35   :  { %445 = vst [vmem:[#allocation2 + $0x68] sm:$0xff] %v444_v39  ;;  %v463_v46 = vrot.slane %v462_v44, 4  ;;  %v472_v47 = vrot.slane %v471_v45, 4  ;;  %v476_v48 = vld [vmem:[#allocation0 + $0xcf] ss:$-1 sm:$0xff] }
  0x36   :  { %v485_v50 = vld [vmem:[#allocation2] sm:$0xf]  ;;  %453 = vst.msk [vmem:[#allocation2 + $0x68] sm:$0xff] %vm271_vm0, %v449_v42  ;;  %459 = vst [vmem:[#allocation2 + $0x70] sm:$0xff] %v458_v43  ;;  %v477_v51 = vrot.slane %v476_v48, 4 }
  0x37   :  { %487 = vst [vmem:[#allocation3] sm:$0xf] %v485_v50  ;;  %v489_v52 = vld [vmem:[#allocation2 + $0x8] sm:$0xf]  ;;  %v506_v53 = vld [vmem:[#allocation2 + $0x20] sm:$0xf] }
  0x38   :  { %467 = vst.msk [vmem:[#allocation2 + $0x70] sm:$0xff] %vm271_vm0, %v463_v46  ;;  %473 = vst [vmem:[#allocation2 + $0x78] sm:$0xff] %v472_v47  ;;  %v494_v54 = vld [vmem:[#allocation2 + $0x10] sm:$0xf]  ;;  %v512_v55 = vld [vmem:[#allocation2 + $0x28] sm:$0xf] }
  0x39   :  { %492 = vst [vmem:[#allocation3 + $0x4] sm:$0xf] %v489_v52  ;;  %510 = vst [vmem:[#allocation3 + $0x10] sm:$0xf] %v506_v53  ;;  %v518_v56 = vld [vmem:[#allocation2 + $0x30] sm:$0xf] }
  0x3a   :  { %481 = vst.msk [vmem:[#allocation2 + $0x78] sm:$0xff] %vm271_vm0, %v477_v51  ;;  %498 = vst [vmem:[#allocation3 + $0x8] sm:$0xf] %v494_v54  ;;  %v500_v49 = vld [vmem:[#allocation2 + $0x18] sm:$0xf] }
  0x3b   :  { %516 = vst [vmem:[#allocation3 + $0x14] sm:$0xf] %v512_v55  ;;  %522 = vst [vmem:[#allocation3 + $0x18] sm:$0xf] %v518_v56  ;;  %v524_v57 = vld [vmem:[#allocation2 + $0x38] sm:$0xf] }
  0x3c   :  { %v530_v58 = vld [vmem:[#allocation2 + $0x40] sm:$0xf]  ;;  %504 = vst [vmem:[#allocation3 + $0xc] sm:$0xf] %v500_v49  ;;  %528 = vst [vmem:[#allocation3 + $0x1c] sm:$0xf] %v524_v57 }
  0x3d   :  { %534 = vst [vmem:[#allocation3 + $0x20] sm:$0xf] %v530_v58  ;;  %v536_v59 = vld [vmem:[#allocation2 + $0x48] sm:$0xf]  ;;  %v542_v60 = vld [vmem:[#allocation2 + $0x50] sm:$0xf] }
  0x3e   :  { %540 = vst [vmem:[#allocation3 + $0x24] sm:$0xf] %v536_v59  ;;  %546 = vst [vmem:[#allocation3 + $0x28] sm:$0xf] %v542_v60  ;;  %v548_v61 = vld [vmem:[#allocation2 + $0x58] sm:$0xf] }
  0x3f   :  { %552 = vst [vmem:[#allocation3 + $0x2c] sm:$0xf] %v548_v61  ;;  %v554_v62 = vld [vmem:[#allocation2 + $0x60] sm:$0xf]  ;;  %v560_v63 = vld [vmem:[#allocation2 + $0x68] sm:$0xf] }
  0x40   :  { %558 = vst [vmem:[#allocation3 + $0x30] sm:$0xf] %v554_v62  ;;  %564 = vst [vmem:[#allocation3 + $0x34] sm:$0xf] %v560_v63  ;;  %v566_v0 = vld [vmem:[#allocation2 + $0x70] sm:$0xf] }
  0x41   :  { %v592_v1 = vld [vmem:[#allocation3] sm:$0xff]   ;;  %570 = vst [vmem:[#allocation3 + $0x38] sm:$0xf] %v566_v0  ;;  %v572_v2 = vld [vmem:[#allocation2 + $0x78] sm:$0xf] }
  0x42   :  { %593 = vst [vmem:[%s892_s1] sm:$0xff] %v592_v1   ;;  %v600_v3 = vld [vmem:[#allocation3 + $0x10] sm:$0xff]   ;;  %576 = vst [vmem:[#allocation3 + $0x3c] sm:$0xf] %v572_v2 }
  0x43   :  { %v596_v4 = vld [vmem:[#allocation3 + $0x8] sm:$0xff]   ;;  %601 = vst [vmem:[%s892_s1 + $0x10] sm:$0xff] %v600_v3   ;;  %v604_v5 = vld [vmem:[#allocation3 + $0x18] sm:$0xff]  }
  0x44   :  { %597 = vst [vmem:[%s892_s1 + $0x8] sm:$0xff] %v596_v4   ;;  %605 = vst [vmem:[%s892_s1 + $0x18] sm:$0xff] %v604_v5  }
  0x45   :  { %v608_v6 = vld [vmem:[#allocation3 + $0x20] sm:$0xff]  }
  0x46   :  { %609 = vst [vmem:[%s892_s1 + $0x20] sm:$0xff] %v608_v6   ;;  %v612_v7 = vld [vmem:[#allocation3 + $0x28] sm:$0xff]  }
  0x47   :  { %613 = vst [vmem:[%s892_s1 + $0x28] sm:$0xff] %v612_v7   ;;  %v616_v8 = vld [vmem:[#allocation3 + $0x30] sm:$0xff]  }
  0x48   :  { %617 = vst [vmem:[%s892_s1 + $0x30] sm:$0xff] %v616_v8  }
  0x49   :  { %v620_v9 = vld [vmem:[#allocation3 + $0x38] sm:$0xff]  }
  0x4a   :  { %621 = vst [vmem:[%s892_s1 + $0x38] sm:$0xff] %v620_v9  }

// kernel: upblock_forward.4
= control target key start
LH: loop header
LB: loop body
LE: loop exit
PB: predicated region body
PF: predicated region fallthrough
CT: control target
= control target key end

     0   :  { %s1815_s0 = inlined_call_operand.vmem [shape: bf16[4,8,16], index: 0, kind: input, shape index: {}]   ;;  %s1816_s1 = inlined_call_operand.vmem [shape: bf16[1,16,512], index: 1, kind: input, shape index: {}]   ;;  %s1817_s2 = inlined_call_operand.<no memory space> [shape: bf16[], index: 2, kind: input, shape index: {}]   ;;  %s1818_s3 = inlined_call_operand.vmem [shape: bf16[1,16,512], index: 3, kind: input, shape index: {}]   ;;  %s1819_s4 = inlined_call_operand.vmem [shape: bf16[1,16,512], index: 4, kind: input, shape index: {}]   ;;  %s1820_s5 = inlined_call_operand.vmem [shape: bf16[1,16,512], index: 5, kind: input, shape index: {}]   ;;  %s1821_s6 = inlined_call_operand.vmem [shape: bf16[4,8,512], index: 6, kind: output, shape index: {0}]   ;;  %s1822_s7 = inlined_call_operand.vmem [shape: f32[8,1], index: 7, kind: output, shape index: {1}]   ;;  %s1823_s8 = inlined_call_operand.vmem [shape: f32[8,1], index: 8, kind: output, shape index: {2}]  }
   0x1   :  { %v14_v0 = vstv %s1817_s2 }
   0x2   :  { %v1708_v1 = vunpack.i.l.bf16 %v14_v0 }
   0x3   :  { %s1710_s29 = smov 0   ;;  %s1712_s30 = smov 0  }
   0x4   :  { %s1714_s9 = smov 0  }
   0x5 LB: > { %s1721_s2 = sadd.s32 4294967295, %s1656_s9   ;;  %s1723_s10 = sadd.s32 1, %s1656_s9   ;;  %s1656_s9 = sphi %s1714_s9, %s1827_s9   ;;  %s1652_s30 = sphi %s1712_s30, %s1826_s30   ;;  %s1648_s29 = sphi %s1710_s29, %s1825_s29  }
   0x6   : > { %s180_s11 = ssub.s32 %s1656_s9, %s1723_s10  ;;  %s183_s12 = sadd.s32 1, %s1652_s30 }
   0x7   : > { %p181_p0 = scmp.eq.s32.totalorder %s180_s11, 0  ;;  %p193_p1 = scmp.ne.s32.totalorder %s1652_s30, %s1648_s29 }
   0x8   : > { %p194_p2 = scmp.eq.s32.totalorder %s1721_s2, 1  ;;  %p1493_p3 = scmp.ge.s32.totalorder %s1656_s9, 1 }
   0x9   : > { %s1730_s13 = scalar_select %p181_p0, %s1652_s30, %s183_s12  }
   0xa   : > { %p1732_p4 = por %p194_p2, %p193_p1  ;;  %p341_p5 = scmp.lt.s32.totalorder %s1656_s9, 3 }
   0xc   : > { %p342_p6 = pnand %p1493_p3, %p341_p5 }
   0xe   : > { %345 = sbr.rel (%p342_p6) target bundleno = 423 (0x1a7), region = 40 }
  0x15   : > { %s407_s15 = sand.u32 1, %s1648_s29   ;;  %s1495_s16 = sshll.u32 %s1721_s2, 1  ;;  %v602_v2 = vpack.c.bf16 %v1708_v1, %v1708_v1 }
  0x16   : > { %s1737_s17 = sshll.u32 %s407_s15, 5  ;;  %p422_p7 = scmp.lt.s32.totalorder %s1495_s16, 3 }
  0x17   : > { %v865_v3 = vmax.bf16 %v602_v2, %v602_v2  ;;  %s1754_s11 = scalar_lea.vmem [#allocation22], %s1737_s17  ;;  %p1523_p8 = scmp.ne.s32.totalorder %s1721_s2, 0 }
  0x18   : > { %s1829_s16 = smov (!%p422_p7, %s1495_s16), 3  ;;  %vm995_vm0 = vcmask (!%p1523_p8), 7168   ;;  %v1658_v31 = vmov (!%p1523_p8), 0.0  }
  0x19   : > { %s1496_s18 = sshll.u32 %s1829_s16, 2  ;;  %v938_v7 = vmax.bf16 %v865_v3, %v602_v2  ;;  %996 = vst.msk [vmem:[%s1822_s7] sm:$0xff] (!%p1523_p8), %vm995_vm0, %v1658_v31  ;;  %997 = vst.msk [vmem:[%s1823_s8] sm:$0xff] (!%p1523_p8), %vm995_vm0, %v1658_v31 }
  0x1a   : > { %s427_s21 = scalar_lea.vmem %s1816_s1, %s1496_s18  ;;  %s447_s24 = scalar_lea.vmem %s1818_s3, %s1496_s18 }
  0x1b   : > { %s467_s27 = scalar_lea.vmem %s1819_s4, %s1496_s18  ;;  %s478_s9 = scalar_lea.vmem %s1820_s5, %s1496_s18  ;;  %v1618_v11 = vld [vmem:[%s447_s24] sm:$0xff]   ;;  %v1619_v13 = vld [vmem:[%s447_s24 + $0x10] sm:$0xff]  }
  0x1c   : > { %v1614_v4 = vld [vmem:[%s478_s9] sm:$0xff]   ;;  %v1615_v6 = vld [vmem:[%s478_s9 + $0x10] sm:$0xff]   ;;  %v869_v19 = vmax.bf16 %v1618_v11, %v865_v3  ;;  %v905_v21 = vmax.bf16 %v1619_v13, %v865_v3 }
  0x1d   : > { %v612_v5 = vmax.bf16 %v1614_v4, %v602_v2  ;;  %v1616_v9 = vld [vmem:[%s467_s27] sm:$0xff]   ;;  %v1617_v10 = vld [vmem:[%s467_s27 + $0x10] sm:$0xff]   ;;  %v763_v12 = vmax.bf16 %v1615_v6, %v602_v2 }
  0x1e   : > { %v1620_v14 = vld [vmem:[%s427_s21] sm:$0xff]   ;;  %v1621_v15 = vld [vmem:[%s427_s21 + $0x10] sm:$0xff]   ;;  %v796_v17 = vmax.bf16 %v1616_v9, %v602_v2  ;;  %v832_v18 = vmax.bf16 %v1617_v10, %v602_v2  ;;  %v873_v26 = vmax.bf16 %v869_v19, %v602_v2  ;;  %v909_v28 = vmax.bf16 %v905_v21, %v602_v2  ;;  %994 = sbr.rel (%p1523_p8) target bundleno = 37 (0x25), region = 44 }
  0x1f   : > { %v616_v8 = vmax.bf16 %v612_v5, %v602_v2  ;;  %v767_v20 = vmax.bf16 %v763_v12, %v602_v2  ;;  %v942_v22 = vmax.bf16 %v1620_v14, %v938_v7  ;;  %v978_v23 = vmax.bf16 %v1621_v15, %v938_v7 }
  0x20   : > { %v800_v24 = vmax.bf16 %v796_v17, %v602_v2  ;;  %v836_v25 = vmax.bf16 %v832_v18, %v602_v2  ;;  %1575 = vst [vmem:[#allocation23 + $0x20] sm:$0xff] %v873_v26   ;;  %1579 = vst [vmem:[#allocation23 + $0x28] sm:$0xff] %v909_v28  }
  0x21   : > { %v620_v16 = vmax.bf16 %v616_v8, %v602_v2  ;;  %v771_v27 = vmax.bf16 %v767_v20, %v602_v2  ;;  %1583 = vst [vmem:[#allocation23 + $0x30] sm:$0xff] %v942_v22   ;;  %1587 = vst [vmem:[#allocation23 + $0x38] sm:$0xff] %v978_v23  }
  0x22   : > { %v804_v29 = vmax.bf16 %v800_v24, %v602_v2  ;;  %v840_v30 = vmax.bf16 %v836_v25, %v602_v2 }
  0x23   : > { %1559 = vst [vmem:[#allocation23] sm:$0xff] %v620_v16   ;;  %1563 = vst [vmem:[#allocation23 + $0x8] sm:$0xff] %v771_v27  }
  0x24   : > { %1567 = vst [vmem:[#allocation23 + $0x10] sm:$0xff] %v804_v29   ;;  %1571 = vst [vmem:[#allocation23 + $0x18] sm:$0xff] %v840_v30  }
  0x25 PF: > { %v1659_v34 = vmov 0   ;;  %v998_v37 = vld [vmem:[%s1815_s0] sm:$0xf]  ;;  %v1528_v38 = vld [vmem:[%s1815_s0 + $0x4] sm:$0xf]  ;;  %vm1011_vm1 = vcmask 130048  }
  0x26   : > { %1047 = vmatprep.mubr.bf16.mxu0 %v1659_v34  ;;  %1125 = vmatprep.mubr.bf16.mxu1 %v1659_v34  ;;  %v1534_v43 = vld [vmem:[%s1815_s0 + $0x8] sm:$0xf]  ;;  %v1540_v44 = vld [vmem:[%s1815_s0 + $0xc] sm:$0xf]  ;;  %v1312_v27 = vld [vmem:[%s1822_s7] sm:$0xff]  ;;  %vm1314_vm2 = vcmask 7168  }
  0x27   : > { %v1628_v39 = vld [vmem:[#allocation23 + $0x20] ss:$8 sps:$4 sm:$0xff]   ;;  %v1630_v40 = vld [vmem:[#allocation23 + $0x24] ss:$8 sps:$4 sm:$0xff]   ;;  %s1555_s18 = sshll.u32 (%p1732_p4), %s1721_s2, 3 }
  0x28   : > { %v1631_v41 = vld [vmem:[#allocation23 + $0x30] ss:$8 sps:$4 sm:$0xff]   ;;  %v1633_v42 = vld [vmem:[#allocation23 + $0x34] ss:$8 sps:$4 sm:$0xff]   ;;  %v1316_v31 = vld [vmem:[%s1823_s8] sm:$0xff]  ;;  %s1328_s20 = scalar_lea.vmem (%p1732_p4), %s1821_s6, %s1555_s18 }
  0x2a   : > { %v1622_v32 = vld [vmem:[#allocation23 + $0x4] ss:$8 sps:$4 sm:$0xff]   ;;  %v1626_v35 = vld [vmem:[#allocation23] ss:$8 sps:$4 sm:$0xff]  }
  0x2b   : > { %v1624_v33 = vld [vmem:[#allocation23 + $0x14] ss:$8 sps:$4 sm:$0xff]   ;;  %1015 = vmatprep.subr.bf16.mxu0 %v1622_v32  ;;  %v1627_v36 = vld [vmem:[#allocation23 + $0x10] ss:$8 sps:$4 sm:$0xff]  }
  0x2c   : > { %1093 = vmatprep.subr.bf16.mxu1 %v1624_v33  ;;  %1016 = vmatpush1.bf16.msra.mxu0 %v1626_v35 }
  0x2d   : > { %1094 = vmatpush1.bf16.msra.mxu1 %v1627_v36  ;;  %1172 = vmatprep.subr.bf16.mxu0 %v1630_v40 }
  0x2e   : > { %1251 = vmatprep.subr.bf16.mxu1 %v1633_v42 }
  0x2f   : > { %1526 = vmatmul.mubr.msk.bf16.vlgmr.msra.gmra.mrb[0].mxu0 %vm1011_vm1, %v998_v37 }
  0x30   : > { %1531 = vmatmul.mubr.msk.bf16.vlgmr.msra.gmra.mrb[0].mxu1 %vm1011_vm1, %v1528_v38  ;;  %1173 = vmatpush1.bf16.msra.mxu0 %v1628_v39 }
  0x31   : > { %1252 = vmatpush1.bf16.msra.mxu1 %v1631_v41  ;;  %1204 = vmatprep.mubr.bf16.mxu0 %v1659_v34 }
  0x32   : > { %1283 = vmatprep.mubr.bf16.mxu1 %v1659_v34 }
  0x37   : > { %1537 = vmatmul.mubr.msk.bf16.vlgmr.msra.gmra.mrb[4].mxu0 %vm1011_vm1, %v1534_v43 }
  0x38   : > { %1543 = vmatmul.mubr.msk.bf16.vlgmr.msra.gmra.mrb[4].mxu1 %vm1011_vm1, %v1540_v44 }
 0x102   : > { %v1049_v45 = vpop.f32.mrb[0].mxu0 }
 0x103   : > { %v1127_v46 = vpop.f32.mrb[0].mxu1  ;;  %v1051_v47 = vpop.f32.mrb[1].mxu0  ;;  %v1060_v50 = vmul.f32 %v1049_v45, %v1049_v45 }
 0x104   : > { %v1129_v48 = vpop.f32.mrb[1].mxu1  ;;  %v1138_v49 = vmul.f32 %v1127_v46, %v1127_v46  ;;  %v1551_v51 = vpack.c.bf16 %v1051_v47, %v1049_v45  ;;  %v1053_v53 = vpop.f32.mrb[2].mxu0  ;;  %v1056_v56 = vadd.f32 %v1051_v47, %v1049_v45  ;;  %v1061_v60 = vmul.f32 %v1051_v47, %v1051_v47 }
 0x105   : > { %v1552_v52 = vpack.c.bf16 %v1129_v48, %v1127_v46  ;;  %v1131_v54 = vpop.f32.mrb[2].mxu1  ;;  %v1134_v55 = vadd.f32 %v1129_v48, %v1127_v46  ;;  %v1054_v57 = vpop.f32.mrb[3].mxu0  ;;  %v1139_v59 = vmul.f32 %v1129_v48, %v1129_v48 }
 0x106   : > { %v1132_v58 = vpop.f32.mrb[3].mxu1  ;;  %1074 = vst [vmem:[%s1754_s11] sm:$0xff] %v1551_v51  ;;  %1057 = vadd.xlane.f32.xlu0 %v1056_v56  ;;  %v1062_v62 = vadd.f32 %v1061_v60, %v1060_v50 }
 0x107   : > { %1533 = vst [vmem:[%s1754_s11 + $0x8] sm:$0xff] %v1552_v52  ;;  %1135 = vadd.xlane.f32.xlu1 %v1134_v55  ;;  %v1140_v61 = vadd.f32 %v1139_v59, %v1138_v49 }
 0x10a   : > { %1063 = vadd.xlane.f32.xlu0 %v1062_v62  ;;  %v1206_v63 = vpop.f32.mrb[4].mxu0 }
 0x10b   : > { %1141 = vadd.xlane.f32.xlu1 %v1140_v61  ;;  %v1285_v0 = vpop.f32.mrb[4].mxu1  ;;  %v1208_v2 = vpop.f32.mrb[5].mxu0  ;;  %v1217_v4 = vmul.f32 %v1206_v63, %v1206_v63 }
 0x10c   : > { %v1287_v3 = vpop.f32.mrb[5].mxu1  ;;  %v1296_v5 = vmul.f32 %v1285_v0, %v1285_v0  ;;  %v1553_v6 = vpack.c.bf16 %v1208_v2, %v1206_v63  ;;  %v1210_v7 = vpop.f32.mrb[6].mxu0  ;;  %v1213_v10 = vadd.f32 %v1208_v2, %v1206_v63  ;;  %v1218_v11 = vmul.f32 %v1208_v2, %v1208_v2 }
 0x10d   : > { %v1554_v8 = vpack.c.bf16 %v1287_v3, %v1285_v0  ;;  %v1289_v9 = vpop.f32.mrb[6].mxu1  ;;  %v1211_v12 = vpop.f32.mrb[7].mxu0  ;;  %v1292_v14 = vadd.f32 %v1287_v3, %v1285_v0  ;;  %v1297_v15 = vmul.f32 %v1287_v3, %v1287_v3  ;;  %v1362_v36 = vld [vmem:[%s1754_s11] sm:$0xff] (%p1732_p4) }
 0x10e   : > { %v1290_v13 = vpop.f32.mrb[7].mxu1  ;;  %1539 = vst [vmem:[%s1754_s11 + $0x10] sm:$0xff] %v1553_v6  ;;  %1214 = vadd.xlane.f32.xlu0 %v1213_v10  ;;  %v1219_v16 = vadd.f32 %v1218_v11, %v1217_v4  ;;  %v1364_v37 = vld [vmem:[%s1754_s11 + $0x8] sm:$0xff] (%p1732_p4)  ;;  %1363 = vst [vmem:[%s1328_s20] sm:$0xff] (%p1732_p4), %v1362_v36 }
 0x10f   : > { %1545 = vst [vmem:[%s1754_s11 + $0x18] sm:$0xff] %v1554_v8  ;;  %v1298_v17 = vadd.f32 %v1297_v15, %v1296_v5  ;;  %1365 = vst [vmem:[%s1328_s20 + $0x10] sm:$0xff] (%p1732_p4), %v1364_v37 }
 0x110   : > { %1220 = vadd.xlane.f32.xlu1 %v1219_v16 }
 0x112   : > { %1293 = vadd.xlane.f32.xlu0 %v1292_v14 }
 0x114   : > { %1299 = vadd.xlane.f32.xlu1 %v1298_v17 }
 0x115   : > { %v1366_v38 = vld [vmem:[%s1754_s11 + $0x10] sm:$0xff] (%p1732_p4) }
 0x116   : > { %v1368_v39 = vld [vmem:[%s1754_s11 + $0x18] sm:$0xff] (%p1732_p4)  ;;  %1367 = vst [vmem:[%s1328_s20 + $0x20] sm:$0xff] (%p1732_p4), %v1366_v38 }
 0x117   : > { %1369 = vst [vmem:[%s1328_s20 + $0x30] sm:$0xff] (%p1732_p4), %v1368_v39 }
 0x193   : > { %v1058_v19 = vpop.xlane.xlu0 %1057 }
 0x194   : > { %v1136_v18 = vpop.xlane.xlu1 %1135 }
 0x195   : > { %v1137_v23 = vadd.f32 %v1136_v18, %v1058_v19 }
 0x197   : > { %v1064_v20 = vpop.xlane.xlu0 %1063 }
 0x198   : > { %v1142_v21 = vpop.xlane.xlu1 %1141 }
 0x199   : > { %v1143_v25 = vadd.f32 %v1142_v21, %v1064_v20 }
 0x19b   : > { %v1215_v22 = vpop.xlane.xlu0 %1214 }
 0x19c   : > { %v1216_v26 = vadd.f32 %v1215_v22, %v1137_v23 }
 0x19d   : > { %v1221_v24 = vpop.xlane.xlu1 %1220 }
 0x19e   : > { %v1222_v29 = vadd.f32 %v1221_v24, %v1143_v25 }
 0x19f   : > { %v1294_v28 = vpop.xlane.xlu0 %1293 }
 0x1a0   : > { %v1295_v30 = vadd.f32 %v1294_v28, %v1216_v26  ;;  %1325 = sbr.rel (!%p1732_p4) target bundleno = 423 (0x1a7), region = 48 }
 0x1a1   : > { %v1300_v32 = vpop.xlane.xlu1 %1299 }
 0x1a2   : > { %v1313_v33 = vadd.f32 %v1312_v27, %v1295_v30  ;;  %v1301_v34 = vadd.f32 %v1300_v32, %v1222_v29 }
 0x1a4   : > { %1315 = vst.msk [vmem:[%s1822_s7] sm:$0xff] %vm1314_vm2, %v1313_v33  ;;  %v1317_v35 = vadd.f32 %v1316_v31, %v1301_v34 }
 0x1a6   : > { %1318 = vst.msk [vmem:[%s1823_s8] sm:$0xff] %vm1314_vm2, %v1317_v35 }
 0x1a7 PF: > { %p36_p9 = scmp.ge.s32.totalorder %s1723_s10, 4   ;;  %s1825_s29 = smov %s1652_s30 }
 0x1a8   : > { %s1826_s30 = smov %s1730_s13  ;;  %s1827_s9 = smov %s1723_s10 }
 0x1a9   :  { %38 = sbr.rel (!%p36_p9) target bundleno = 5 (0x5), region = 200 }

// kernel: upblock_forward.3
= control target key start
LH: loop header
LB: loop body
LE: loop exit
PB: predicated region body
PF: predicated region fallthrough
CT: control target
= control target key end

     0   :  { %s455_s12 = smov 0   ;;  %s457_s13 = smov 0   ;;  %s521_s0 = inlined_call_operand.vmem [shape: bf16[4,8,512], index: 0, kind: input, shape index: {}]   ;;  %s522_s1 = inlined_call_operand.vmem [shape: f32[8,1], index: 1, kind: input, shape index: {}]   ;;  %s523_s2 = inlined_call_operand.vmem [shape: f32[8,1], index: 2, kind: input, shape index: {}]   ;;  %s524_s3 = inlined_call_operand.vmem [shape: f32[4,8,512], index: 3, kind: output, shape index: {}]  }
   0x1   :  { %s459_s14 = smov 0  }
   0x2 LB: > { %s367_s15 = sadd.s32 4294967295, %s432_s14   ;;  %s472_s16 = sadd.s32 1, %s432_s14   ;;  %s432_s14 = sphi %s459_s14, %s528_s14   ;;  %s428_s13 = sphi %s457_s13, %s527_s13   ;;  %s424_s12 = sphi %s455_s12, %s526_s12  }
   0x3   : > { %s17_s17 = ssub.s32 %s432_s14, %s472_s16  ;;  %s20_s18 = sadd.s32 1, %s428_s13 }
   0x4   : > { %p18_p0 = scmp.eq.s32.totalorder %s17_s17, 0  ;;  %p27_p1 = scmp.ne.s32.totalorder %s428_s13, %s424_s12 }
   0x5   : > { %p28_p2 = scmp.eq.s32.totalorder %s432_s14, 0  ;;  %p99_p3 = scmp.eq.s32.totalorder %s367_s15, 1 }
   0x6   : > { %s483_s19 = scalar_select %p18_p0, %s428_s13, %s20_s18  }
   0x7   : > { %p29_p4 = por %p28_p2, %p27_p1  ;;  %p485_p5 = por %p99_p3, %p27_p1 }
   0x8   : > { %p370_p6 = scmp.ge.s32.totalorder %s432_s14, 2 }
   0xa   : > { %127 = sbr.rel (%p370_p6) target bundleno = 24 (0x18), region = 24 }
  0x11   : > { %130 = sbr.rel (!%p29_p4) target bundleno = 24 (0x18), region = 28  ;;  %s132_s21 = sand.u32 (%p29_p4), 1, %s428_s13  }
  0x12   : > { %s382_s22 = sshll.u32 (%p29_p4), %s432_s14, 3  ;;  %s371_s23 = sshll.u32 (%p29_p4), %s132_s21, 5 }
  0x13   : > { %s137_s26 = scalar_lea.vmem (%p29_p4), %s521_s0, %s382_s22  ;;  %s134_s27 = scalar_lea.vmem (%p29_p4), [#allocation2], %s371_s23 }
  0x14   : > { %v171_v0 = vld [vmem:[%s137_s26] sm:$0xff] (%p29_p4)  ;;  %v173_v1 = vld [vmem:[%s137_s26 + $0x10] sm:$0xff] (%p29_p4) }
  0x15   : > { %v175_v2 = vld [vmem:[%s137_s26 + $0x20] sm:$0xff] (%p29_p4)  ;;  %172 = vst [vmem:[%s134_s27] sm:$0xff] (%p29_p4), %v171_v0  ;;  %174 = vst [vmem:[%s134_s27 + $0x8] sm:$0xff] (%p29_p4), %v173_v1  ;;  %v177_v3 = vld [vmem:[%s137_s26 + $0x30] sm:$0xff] (%p29_p4) }
  0x16   : > { %176 = vst [vmem:[%s134_s27 + $0x10] sm:$0xff] (%p29_p4), %v175_v2  ;;  %178 = vst [vmem:[%s134_s27 + $0x18] sm:$0xff] (%p29_p4), %v177_v3 }
  0x18 PF: > { %p374_p7 = scmp.ge.s32.totalorder %s432_s14, 1  ;;  %p183_p8 = scmp.lt.s32.totalorder %s432_s14, 3 }
  0x1a   : > { %p184_p9 = pnand %p374_p7, %p183_p8 }
  0x1b   : > { %v226_v4 = vld [vmem:[%s522_s1] sm:$0xff] (!%p184_p9)  ;;  %v434_v5 = vmov (!%p184_p9), 0   ;;  %s190_s5 = sand.u32 (!%p184_p9), 1, %s424_s12  }
  0x1c   : > { %187 = sbr.rel (%p184_p9) target bundleno = 177 (0xb1), region = 66  ;;  %409 = vset.pattern.permute.xlu0 (!%p184_p9), %v434_v5  ;;  %v240_v6 = vld [vmem:[%s523_s2] sm:$0xff] (!%p184_p9)  ;;  %s375_s6 = sshll.u32 (!%p184_p9), %s190_s5, 5 }
  0x1d   : > { %229 = vperm.xlu0 (!%p184_p9), %409, %v226_v4   ;;  %s192_s7 = scalar_lea.vmem (!%p184_p9), [#allocation2], %s375_s6  ;;  %s376_s8 = sshll.u32 (!%p184_p9), %s190_s5, 6 }
  0x1e   : > { %v214_v7 = vld [vmem:[%s192_s7] sm:$0xff] (!%p184_p9)  ;;  %v215_v8 = vld [vmem:[%s192_s7 + $0x8] sm:$0xff] (!%p184_p9)  ;;  %v216_v9 = vld [vmem:[%s192_s7 + $0x10] sm:$0xff] (!%p184_p9)  ;;  %s211_s9 = scalar_lea.vmem (!%p184_p9), [#allocation3], %s376_s8 }
  0x1f   : > { %v217_v10 = vld [vmem:[%s192_s7 + $0x18] sm:$0xff] (!%p184_p9)  ;;  %v218_v11 = vunpack.c.l.bf16 (!%p184_p9), %v214_v7  ;;  %v219_v12 = vunpack.c.h.bf16 (!%p184_p9), %v214_v7  ;;  %v220_v13 = vunpack.c.l.bf16 (!%p184_p9), %v215_v8  ;;  %v221_v14 = vunpack.c.h.bf16 (!%p184_p9), %v215_v8 }
  0x20   : > { %v222_v16 = vunpack.c.l.bf16 (!%p184_p9), %v216_v9  ;;  %v223_v17 = vunpack.c.h.bf16 (!%p184_p9), %v216_v9  ;;  %v224_v18 = vunpack.c.l.bf16 (!%p184_p9), %v217_v10  ;;  %v225_v19 = vunpack.c.h.bf16 (!%p184_p9), %v217_v10 }
  0x21   : > { %243 = vperm.xlu0 (!%p184_p9), %409, %v240_v6  }
  0x23   : > { %s383_s10 = sshll.u32 (%p485_p5), %s367_s15, 4 }
  0x24   : > { %s279_s17 = scalar_lea.vmem (%p485_p5), %s524_s3, %s383_s10 }
  0x9c   : > { %v230_v15 = vpop.permute.xlu0 %229 }
  0x9d   : > { %v232_v20 = vmul.f32 %v230_v15, %v218_v11  ;;  %v233_v21 = vmul.f32 %v230_v15, %v219_v12  ;;  %v234_v22 = vmul.f32 %v230_v15, %v220_v13  ;;  %v235_v23 = vmul.f32 %v230_v15, %v221_v14 }
  0x9e   : > { %v236_v25 = vmul.f32 %v230_v15, %v222_v16  ;;  %v237_v26 = vmul.f32 %v230_v15, %v223_v17  ;;  %v238_v27 = vmul.f32 %v230_v15, %v224_v18  ;;  %v239_v28 = vmul.f32 %v230_v15, %v225_v19 }
  0xa0   : > { %v244_v24 = vpop.permute.xlu0 %243 }
  0xa1   : > { %v246_v29 = vadd.f32 %v244_v24, %v232_v20  ;;  %v247_v30 = vadd.f32 %v244_v24, %v233_v21  ;;  %v248_v31 = vadd.f32 %v244_v24, %v234_v22  ;;  %v249_v32 = vadd.f32 %v244_v24, %v235_v23 }
  0xa2   : > { %v250_v33 = vadd.f32 %v244_v24, %v236_v25  ;;  %v251_v34 = vadd.f32 %v244_v24, %v237_v26  ;;  %v252_v35 = vadd.f32 %v244_v24, %v238_v27  ;;  %v253_v36 = vadd.f32 %v244_v24, %v239_v28  ;;  %276 = sbr.rel (!%p485_p5) target bundleno = 177 (0xb1), region = 74 }
  0xa3   : > { %v254_v37 = vmax.f32 %v246_v29, 0.0  ;;  %v255_v38 = vmax.f32 %v247_v30, 0.0  ;;  %v256_v39 = vmax.f32 %v248_v31, 0.0  ;;  %v257_v40 = vmax.f32 %v249_v32, 0.0 }
  0xa4   : > { %v258_v41 = vmax.f32 %v250_v33, 0.0  ;;  %v259_v42 = vmax.f32 %v251_v34, 0.0  ;;  %v260_v43 = vmax.f32 %v252_v35, 0.0  ;;  %v261_v44 = vmax.f32 %v253_v36, 0.0 }
  0xa5   : > { %262 = vst [vmem:[%s211_s9] sm:$0xff] %v254_v37  ;;  %263 = vst [vmem:[%s211_s9 + $0x8] sm:$0xff] %v255_v38 }
  0xa6   : > { %264 = vst [vmem:[%s211_s9 + $0x10] sm:$0xff] %v256_v39  ;;  %265 = vst [vmem:[%s211_s9 + $0x18] sm:$0xff] %v257_v40 }
  0xa7   : > { %266 = vst [vmem:[%s211_s9 + $0x20] sm:$0xff] %v258_v41  ;;  %267 = vst [vmem:[%s211_s9 + $0x28] sm:$0xff] %v259_v42 }
  0xa8   : > { %268 = vst [vmem:[%s211_s9 + $0x30] sm:$0xff] %v260_v43  ;;  %269 = vst [vmem:[%s211_s9 + $0x38] sm:$0xff] %v261_v44 }
  0xac   : > { %v292_v45 = vld [vmem:[%s211_s9] sm:$0xff]  ;;  %v294_v46 = vld [vmem:[%s211_s9 + $0x8] sm:$0xff] }
  0xad   : > { %v296_v47 = vld [vmem:[%s211_s9 + $0x10] sm:$0xff]  ;;  %v298_v48 = vld [vmem:[%s211_s9 + $0x18] sm:$0xff]  ;;  %293 = vst [vmem:[%s279_s17] sm:$0xff] %v292_v45  ;;  %295 = vst [vmem:[%s279_s17 + $0x8] sm:$0xff] %v294_v46 }
  0xae   : > { %v300_v49 = vld [vmem:[%s211_s9 + $0x20] sm:$0xff]  ;;  %v302_v50 = vld [vmem:[%s211_s9 + $0x28] sm:$0xff]  ;;  %297 = vst [vmem:[%s279_s17 + $0x20] sm:$0xff] %v296_v47  ;;  %299 = vst [vmem:[%s279_s17 + $0x28] sm:$0xff] %v298_v48 }
  0xaf   : > { %301 = vst [vmem:[%s279_s17 + $0x40] sm:$0xff] %v300_v49  ;;  %303 = vst [vmem:[%s279_s17 + $0x48] sm:$0xff] %v302_v50  ;;  %v304_v51 = vld [vmem:[%s211_s9 + $0x30] sm:$0xff]  ;;  %v306_v52 = vld [vmem:[%s211_s9 + $0x38] sm:$0xff] }
  0xb0   : > { %305 = vst [vmem:[%s279_s17 + $0x60] sm:$0xff] %v304_v51  ;;  %307 = vst [vmem:[%s279_s17 + $0x68] sm:$0xff] %v306_v52 }
  0xb1 PF: > { %p10_p10 = scmp.ge.s32.totalorder %s472_s16, 4   ;;  %s526_s12 = smov %s428_s13 }
  0xb2   : > { %s527_s13 = smov %s483_s19  ;;  %s528_s14 = smov %s472_s16 }
  0xb3   :  { %12 = sbr.rel (!%p10_p10) target bundleno = 2 (0x2), region = 128 }

</bundles_post_ra>
